<compile_context>
chip_gen: v6e
topology: v6e:2x2x1
jax: 0.10.0
libtpu: 0.0.40
codegen_flags: <defaults>
</compile_context>

<pallas_src>
import numpy as np
import jax
import jax.numpy as jnp
from jax.experimental import pallas as pl
from jax.experimental.pallas import tpu as pltpu


def lmr_kernel(e0_ref, e1_ref, sd_ref, o_ref, acc_ref):
    """Lane-dense body.

    e0_ref / e1_ref : (D, TP)  endpoint embeddings of this pair tile
    sd_ref          : (1, TP)  target distances
    o_ref           : (1, 1)   scalar loss (written only on the last step)
    acc_ref         : (1, TP)  lane-dense running sum of squared errors
    """
    @pl.when(pl.program_id(0) == 0)
    def _():
        acc_ref[...] = jnp.zeros_like(acc_ref)

    d = e0_ref[...].astype(jnp.float32) - e1_ref[...].astype(jnp.float32)  # (D, TP)
    sq = jnp.sum(d * d, axis=0, keepdims=True)                             # (1, TP)
    err = sd_ref[...] - jnp.sqrt(sq)                                       # (1, TP)
    acc_ref[...] += err * err

    @pl.when(pl.program_id(0) == pl.num_programs(0) - 1)
    def _():
        # Single cross-lane reduce at the very end (instead of one per step).
        o_ref[...] = jnp.sum(acc_ref[...], keepdims=True)


def _choose_pair_tile(D, itemsize, requested=2048, vmem_budget_bytes=8 << 20):
    """Pick the pair tile: as big as requested, but keep the double-buffered
    endpoint inputs (2 arrays x 2 buffers x D x TP) within a conservative VMEM
    budget so the same choice is safe on v7x (64 MiB physical) and v5e/v6e."""
    max_tp = vmem_budget_bytes // (2 * 2 * max(D, 1) * itemsize)
    tp = int(min(requested, max_tp))
    tp = max(128, (tp // 128) * 128)   # lane-dense tiles: multiple of 128 lanes
    return tp


def local_metric_regularizer(emb, indices, small_dists, *, tp=None):
    """emb: (N, D), indices: (P, 2) i32, small_dists: (P,) -> scalar f32."""
    P = indices.shape[0]
    D = emb.shape[1]
    itemsize = jnp.dtype(emb.dtype).itemsize

    if tp is None:
        tp = _choose_pair_tile(D, itemsize)

    # Gather the two endpoints of each pair, transposed so pairs land on the
    # lane axis.  Keep emb's dtype (no up-cast) across the HBM->VMEM DMA.
    # TODO(synk): for P*D >> N*D, move this gather in-kernel (emb resident in
    # VMEM, indices via PrefetchScalarGridSpec scalar prefetch) to avoid
    # materializing 2*P*D gathered elements in HBM.
    embT = emb.T                                    # (D, N)
    e0t = jnp.take(embT, indices[:, 0], axis=1)     # (D, P)
    e1t = jnp.take(embT, indices[:, 1], axis=1)     # (D, P)
    sd = small_dists.astype(jnp.float32)            # (P,)

    # Pad P up to a multiple of the pair tile.  Padded pairs have e0=e1=0 and
    # sd=0, so they contribute (0 - 0)^2 = 0 to the forward loss.
    P_pad = max(tp, ((P + tp - 1) // tp) * tp)
    pad = P_pad - P
    e0t = jnp.pad(e0t, ((0, 0), (0, pad)))
    e1t = jnp.pad(e1t, ((0, 0), (0, pad)))
    sd = jnp.pad(sd, (0, pad)).reshape(1, P_pad)

    cost = pl.CostEstimate(
        flops=3 * P_pad * D,
        transcendentals=P_pad,
        bytes_accessed=2 * P_pad * D * itemsize + P_pad * 4 + 4,
    )

    out = pl.pallas_call(
        lmr_kernel,
        out_shape=jax.ShapeDtypeStruct((1, 1), jnp.float32),
        grid=(P_pad // tp,),
        in_specs=[
            pl.BlockSpec((D, tp), lambda i: (0, i)),   # e0, pairs on lanes
            pl.BlockSpec((D, tp), lambda i: (0, i)),   # e1
            pl.BlockSpec((1, tp), lambda i: (0, i)),   # small_dists
        ],
        out_specs=pl.BlockSpec((1, 1), lambda i: (0, 0)),
        scratch_shapes=[pltpu.VMEM((1, tp), jnp.float32)],
        compiler_params=pltpu.CompilerParams(
            # Scratch accumulates across the grid -> reduction axis.
            dimension_semantics=("arbitrary",),
            # Explicit scoped-VMEM limit: bumps v5e's 16 MiB default, stays
            # within v7x's 64 MiB physical VMEM.
            vmem_limit_bytes=32 * 1024 * 1024,
        ),
        cost_estimate=cost,
    )(e0t, e1t, sd)
    return out[0, 0]


def local_metric_regularizer_ref(emb, indices, small_dists):
    diffs = emb[indices[:, 0]] - emb[indices[:, 1]]
    d_emb = jnp.sqrt(jnp.sum(diffs * diffs, axis=1))
    return jnp.sum((small_dists - d_emb) ** 2)


if __name__ == "__main__":
    N, D = 16, 32  # 16 nodes, 32-dim embedding

    key = jax.random.PRNGKey(0)
    k1, k2 = jax.random.split(key)

    # Deterministic synthetic "dist_mat" / "mask" (mirrors the module __init__).
    base = jax.random.normal(k1, (N, 4), dtype=jnp.float32)
    dist_mat = jnp.sqrt(
        jnp.sum((base[:, None, :] - base[None, :, :]) ** 2, axis=-1)
    )
    mask = (dist_mat < 2.5) & (dist_mat > 0.0)

    # Static (host-side) equivalent of torch.nonzero(mask) / dist_mat[mask];
    # both use row-major order, matching PyTorch.
    mask_np = np.asarray(mask)
    dist_np = np.asarray(dist_mat)
    indices = jnp.asarray(
        np.stack(np.nonzero(mask_np), axis=1).astype(np.int32)
    )                                                               # (P, 2)
    small_dists = jnp.asarray(dist_np[mask_np].astype(np.float32))  # (P,)

    emb = jax.random.normal(k2, (N, D), dtype=jnp.float32)

    loss = local_metric_regularizer(emb, indices, small_dists)
    loss = jax.block_until_ready(loss)

    ref = jax.block_until_ready(
        local_metric_regularizer_ref(emb, indices, small_dists)
    )
    np.testing.assert_allclose(np.asarray(loss), np.asarray(ref), rtol=1e-5, atol=1e-5)

    print("KERNEL_OK")
</pallas_src>

<mosaic_0001>
module attributes {stable_mosaic.version = 11 : i64} {
  func.func @lmr_kernel(%arg0: i32, %arg1: memref<32x2048xf32, #tpu.memory_space<vmem>>, %arg2: memref<32x2048xf32, #tpu.memory_space<vmem>>, %arg3: memref<1x2048xf32, #tpu.memory_space<vmem>>, %arg4: memref<1x1xf32, #tpu.memory_space<vmem>>, %arg5: memref<1x2048xf32, #tpu.memory_space<vmem>>) attributes {dimension_semantics = [#tpu.dimension_semantics<arbitrary>], iteration_bounds = array<i64: 1>, scalar_prefetch = 0 : i64, scratch_operands = 1 : i64, tpu.core_type = #tpu.core_type<tc>, window_params = [{transform_indices = @transform_0, window_bounds = array<i64: 32, 2048>}, {transform_indices = @transform_1, window_bounds = array<i64: 32, 2048>}, {transform_indices = @transform_2, window_bounds = array<i64: 1, 2048>}, {pipeline_mode = #tpu.pipeline_mode<synchronous>, transform_indices = @transform_3, window_bounds = array<i64: 1, 1>}]} {
    %c0_i32 = arith.constant 0 : i32
    %0 = arith.cmpi eq, %arg0, %c0_i32 : i32
    %1 = arith.extui %0 : i1 to i32
    %c0_i32_0 = arith.constant 0 : i32
    %2 = arith.cmpi ne, %1, %c0_i32_0 : i32
    scf.if %2 {
      %cst_12 = arith.constant 0.000000e+00 : f32
      %19 = vector.broadcast %cst_12 : f32 to vector<1x2048xf32>
      %c0_13 = arith.constant 0 : index
      %c0_14 = arith.constant 0 : index
      %20 = vector.load %arg5[%c0_13, %c0_14] : memref<1x2048xf32, #tpu.memory_space<vmem>>, vector<1x2048xf32>
      tpu.vector_store %arg5[%c0_13, %c0_14], %19 {strides = array<i32>} : memref<1x2048xf32, #tpu.memory_space<vmem>>, vector<1x2048xf32>,
    } else {
    }
    %c0 = arith.constant 0 : index
    %c0_1 = arith.constant 0 : index
    %3 = vector.load %arg1[%c0, %c0_1] : memref<32x2048xf32, #tpu.memory_space<vmem>>, vector<32x2048xf32>
    %c0_2 = arith.constant 0 : index
    %c0_3 = arith.constant 0 : index
    %4 = vector.load %arg2[%c0_2, %c0_3] : memref<32x2048xf32, #tpu.memory_space<vmem>>, vector<32x2048xf32>
    %5 = arith.subf %3, %4 : vector<32x2048xf32>
    %6 = arith.mulf %5, %5 : vector<32x2048xf32>
    %cst = arith.constant dense<0.000000e+00> : vector<2048xf32>
    %7 = vector.multi_reduction <add>, %6, %cst [0] : vector<32x2048xf32> to vector<2048xf32>
    %8 = vector.shape_cast %7 : vector<2048xf32> to vector<1x2048xf32>
    %c0_4 = arith.constant 0 : index
    %c0_5 = arith.constant 0 : index
    %9 = vector.load %arg3[%c0_4, %c0_5] : memref<1x2048xf32, #tpu.memory_space<vmem>>, vector<1x2048xf32>
    %10 = math.sqrt %8 : vector<1x2048xf32>
    %11 = arith.subf %9, %10 : vector<1x2048xf32>
    %c0_6 = arith.constant 0 : index
    %c0_7 = arith.constant 0 : index
    %12 = vector.load %arg5[%c0_6, %c0_7] : memref<1x2048xf32, #tpu.memory_space<vmem>>, vector<1x2048xf32>
    %13 = arith.mulf %11, %11 : vector<1x2048xf32>
    %14 = arith.addf %12, %13 : vector<1x2048xf32>
    %c0_8 = arith.constant 0 : index
    %c0_9 = arith.constant 0 : index
    %15 = vector.load %arg5[%c0_8, %c0_9] : memref<1x2048xf32, #tpu.memory_space<vmem>>, vector<1x2048xf32>
    tpu.vector_store %arg5[%c0_8, %c0_9], %14 {strides = array<i32>} : memref<1x2048xf32, #tpu.memory_space<vmem>>, vector<1x2048xf32>,
    %c0_i32_10 = arith.constant 0 : i32
    %16 = arith.cmpi eq, %arg0, %c0_i32_10 : i32
    %17 = arith.extui %16 : i1 to i32
    %c0_i32_11 = arith.constant 0 : i32
    %18 = arith.cmpi ne, %17, %c0_i32_11 : i32
    scf.if %18 {
      %c0_12 = arith.constant 0 : index
      %c0_13 = arith.constant 0 : index
      %19 = vector.load %arg5[%c0_12, %c0_13] : memref<1x2048xf32, #tpu.memory_space<vmem>>, vector<1x2048xf32>
      %20 = vector.shape_cast %19 : vector<1x2048xf32> to vector<1x1x2048xf32>
      %cst_14 = arith.constant dense<0.000000e+00> : vector<1xf32>
      %21 = vector.multi_reduction <add>, %20, %cst_14 [1, 2] : vector<1x1x2048xf32> to vector<1xf32>
      %22 = vector.shape_cast %21 : vector<1xf32> to vector<1x1x1xf32>
      %23 = vector.extract %22[0, 0, 0] : f32 from vector<1x1x1xf32>
      %24 = vector.broadcast %23 : f32 to vector<1x1xf32>
      %c0_15 = arith.constant 0 : index
      %c0_16 = arith.constant 0 : index
      %25 = vector.load %arg4[%c0_15, %c0_16] : memref<1x1xf32, #tpu.memory_space<vmem>>, vector<1x1xf32>
      tpu.vector_store %arg4[%c0_15, %c0_16], %24 {strides = array<i32>} : memref<1x1xf32, #tpu.memory_space<vmem>>, vector<1x1xf32>,
    } else {
    }
    return
  }
  func.func @transform_0(%arg0: i32) -> (i32, i32) {
    %c0_i32 = arith.constant 0 : i32
    %c0_i32_0 = arith.constant 0 : i32
    return %c0_i32, %arg0 : i32, i32
  }
  func.func @transform_1(%arg0: i32) -> (i32, i32) {
    %c0_i32 = arith.constant 0 : i32
    %c0_i32_0 = arith.constant 0 : i32
    return %c0_i32, %arg0 : i32, i32
  }
  func.func @transform_2(%arg0: i32) -> (i32, i32) {
    %c0_i32 = arith.constant 0 : i32
    %c0_i32_0 = arith.constant 0 : i32
    return %c0_i32, %arg0 : i32, i32
  }
  func.func @transform_3(%arg0: i32) -> (i32, i32) {
    %c0_i32 = arith.constant 0 : i32
    %c0_i32_0 = arith.constant 0 : i32
    %c0_i32_1 = arith.constant 0 : i32
    return %c0_i32, %c0_i32_0 : i32, i32
  }
}

</mosaic_0001>

<bundles_post_ra>
// kernel: tpu_custom_call.1
= control target key start
LH: loop header
LB: loop body
LE: loop exit
PB: predicated region body
PF: predicated region fallthrough
CT: control target
= control target key end

     0   :  { %8 = vsyncpa [#allocation4], 0  ;;  %s1590_s0 = inlined_call_operand.hbm [shape: f32[32,2048], index: 0, kind: input, shape index: {}]   ;;  %s1591_s1 = inlined_call_operand.hbm [shape: f32[32,2048], index: 1, kind: input, shape index: {}]   ;;  %s1592_s2 = inlined_call_operand.hbm [shape: f32[1,2048], index: 2, kind: input, shape index: {}]   ;;  %s1593_s3 = inlined_call_operand.hbm [shape: f32[1,1], index: 3, kind: output, shape index: {}]  }
   0x1   :  { %9 = vsyncpa [#allocation7], 0 }
   0x2   :  { %10 = vsyncpa [#allocation5], 0  ;;  %s974_s12 = smov [#allocation6]   ;;  %s975_s14 = smov [#allocation3]  }
   0x3   :  { %s28_s13 = sshll.u32 %s974_s12, 4  ;;  %s16_s15 = sshll.u32 %s975_s14, 4  ;;  %s29_s13 = int_to_ptr.vmem [resolvable:$true] %s28_s13  ;;  %s17_s15 = int_to_ptr.vmem [resolvable:$true] %s16_s15 }
   0x4   :  { %s896_s16 = scalar_lea.vmem %s29_s13, 8192  ;;  %p901_p1 = scmp.lt.s32.totalorder %s29_s13, %s29_s13 }
   0x5   :  { %p897_p0 = scmp.ne.s32.totalorder %s29_s13, %s896_s16  ;;  %p902_p2 = scmp.lt.s32.totalorder %s896_s16, %s896_s16 }
   0x7   :  { %p903_p3 = por %p902_p2, %p901_p1 }
   0x9   :  { %p904_p4 = pnand %p903_p3, %p897_p0 }
   0xb   :  { %907 = shalt.err (!%p904_p4)
}
   0xc   :  { %s976_s17 = smov 2048   ;;  %s977_s18 = smov 128  }
   0xd   :  { %34 = dma.hbm_to_vmem [thread:$0]  %s1591_s1, 8192, %s29_s13, [#allocation7], %s976_s17, %s976_s17, %s977_s18  }
   0xe   :  { %s916_s21 = scalar_lea.vmem %s17_s15, 8192  ;;  %p921_p6 = scmp.lt.s32.totalorder %s17_s15, %s17_s15 }
   0xf   :  { %p917_p5 = scmp.ne.s32.totalorder %s17_s15, %s916_s21  ;;  %p922_p7 = scmp.lt.s32.totalorder %s916_s21, %s916_s21 }
  0x11   :  { %p923_p8 = por %p922_p7, %p921_p6 }
  0x13   :  { %p924_p9 = pnand %p923_p8, %p917_p5 }
  0x15   :  { %927 = shalt.err (!%p924_p9)
}
  0x16   :  { %22 = dma.hbm_to_vmem [thread:$0]  %s1590_s0, 8192, %s17_s15, [#allocation4], %s976_s17, %s976_s17, %s977_s18  }
  0x17   :  { %s978_s24 = smov [#allocation8]  }
  0x18   :  { %s41_s25 = sshll.u32 %s978_s24, 4  ;;  %s42_s25 = int_to_ptr.vmem [resolvable:$true] %s41_s25 }
  0x19   :  { %s936_s26 = scalar_lea.vmem %s42_s25, 256  ;;  %p941_p11 = scmp.lt.s32.totalorder %s42_s25, %s42_s25 }
  0x1a   :  { %p937_p10 = scmp.ne.s32.totalorder %s42_s25, %s936_s26  ;;  %p942_p12 = scmp.lt.s32.totalorder %s936_s26, %s936_s26 }
  0x1c   :  { %p943_p13 = por %p942_p12, %p941_p11 }
  0x1e   :  { %p944_p0 = pnand %p943_p13, %p937_p10 }
  0x20   :  { %947 = shalt.err (!%p944_p0)
}
  0x21   :  { %44 = dma.hbm_to_vmem [thread:$0]  %s1592_s2, 256, %s42_s25, [#allocation7]  }
  0x22   :  { %968 = dma.done.wait [#allocation4], 8192  }
  0x23   :  { %969 = vsyncadd [#allocation4], 4294959104 }
  0x24   :  { %970 = dma.done.wait [#allocation7], 8448  }
  0x25   :  { %971 = vsyncadd [#allocation7], 4294958848  ;;  %v60_v0 = vld [vmem:[#allocation3] sm:$0xff]  ;;  %v61_v1 = vld [vmem:[#allocation3 + $0x8] sm:$0xff]  ;;  %v979_v10 = vmov 1966171168   ;;  %v597_v12 = vlaneseq }
  0x26   :  { %v62_v2 = vld [vmem:[#allocation3 + $0x10] sm:$0xff]  ;;  %v63_v3 = vld [vmem:[#allocation3 + $0x18] sm:$0xff]  ;;  %v124_v4 = vld [vmem:[#allocation6] sm:$0xff]  ;;  %v1010_v11 = vunpack.c.l.s4 %v979_v10  ;;  %s980_s0 = smov [#allocation9]  }
  0x27   :  { %v64_v5 = vld [vmem:[#allocation3 + $0x20] sm:$0xff]  ;;  %v65_v6 = vld [vmem:[#allocation3 + $0x28] sm:$0xff]  ;;  %v66_v7 = vld [vmem:[#allocation3 + $0x30] sm:$0xff]  ;;  %v188_v25 = vsub.f32 %v60_v0, %v124_v4  ;;  %v1013_v42 = vshrl.u32 %v597_v12, 7  ;;  %s837_s2 = sshll.u32 %s980_s0, 4  ;;  %s838_s2 = int_to_ptr.vmem [resolvable:$true] %s837_s2 }
  0x28   :  { %v67_v8 = vld [vmem:[#allocation3 + $0x38] sm:$0xff]  ;;  %v125_v9 = vld [vmem:[#allocation6 + $0x8] sm:$0xff]  ;;  %1596 = vst [vmem:[#allocation13_spill] sm:$0xff] %v1010_v11  ;;  %v68_v13 = vld [vmem:[#allocation3 + $0x40] sm:$0xff]  ;;  %s948_s29 = scalar_lea.vmem %s838_s2, 16  ;;  %s952_s30 = scalar_lea.vmem %s838_s2, 32 }
  0x29   :  { %v69_v14 = vld [vmem:[#allocation3 + $0x48] sm:$0xff]  ;;  %v70_v15 = vld [vmem:[#allocation3 + $0x50] sm:$0xff]  ;;  %v127_v17 = vld [vmem:[#allocation6 + $0x18] sm:$0xff]  ;;  %v189_v32 = vsub.f32 %v61_v1, %v125_v9  ;;  %1597 = vst [vmem:[#allocation14_spill] sm:$0xff] %v1013_v42  ;;  %v1025_v62 = vmul.f32 %v188_v25, %v188_v25  ;;  %p949_p1 = scmp.ne.s32.totalorder %s838_s2, %s948_s29  ;;  %p953_p2 = scmp.lt.s32.totalorder %s838_s2, %s838_s2 }
  0x2a   :  { %v126_v16 = vld [vmem:[#allocation6 + $0x10] sm:$0xff]  ;;  %v128_v18 = vld [vmem:[#allocation6 + $0x20] sm:$0xff]  ;;  %v71_v19 = vld [vmem:[#allocation3 + $0x58] sm:$0xff]  ;;  %v191_v40 = vsub.f32 %v63_v3, %v127_v17  ;;  %p954_p3 = scmp.lt.s32.totalorder %s952_s30, %s948_s29 }
  0x2b   :  { %v72_v20 = vld [vmem:[#allocation3 + $0x60] sm:$0xff]  ;;  %v73_v21 = vld [vmem:[#allocation3 + $0x68] sm:$0xff]  ;;  %v130_v23 = vld [vmem:[#allocation6 + $0x30] sm:$0xff]  ;;  %v190_v39 = vsub.f32 %v62_v2, %v126_v16  ;;  %v192_v49 = vsub.f32 %v64_v5, %v128_v18  ;;  %1598 = vst [vmem:[#allocation15_spill] sm:$0xff] %v1025_v62 }
  0x2c   :  { %v129_v22 = vld [vmem:[#allocation6 + $0x28] sm:$0xff]  ;;  %v131_v24 = vld [vmem:[#allocation6 + $0x38] sm:$0xff]  ;;  %v74_v26 = vld [vmem:[#allocation3 + $0x70] sm:$0xff]  ;;  %v1015_v51 = vsub.f32 %v66_v7, %v130_v23  ;;  %p955_p4 = por %p954_p3, %p953_p2 }
  0x2d   :  { %v75_v27 = vld [vmem:[#allocation3 + $0x78] sm:$0xff]  ;;  %v76_v28 = vld [vmem:[#allocation3 + $0x80] sm:$0xff]  ;;  %v133_v30 = vld [vmem:[#allocation6 + $0x48] sm:$0xff]  ;;  %v193_v50 = vsub.f32 %v65_v6, %v129_v22  ;;  %v1017_v52 = vsub.f32 %v67_v8, %v131_v24  ;;  %v1033_v8 = vmul.f32 %v189_v32, %v189_v32 }
  0x2e   :  { %v132_v29 = vld [vmem:[#allocation6 + $0x40] sm:$0xff]  ;;  %v134_v31 = vld [vmem:[#allocation6 + $0x50] sm:$0xff]  ;;  %v77_v33 = vld [vmem:[#allocation3 + $0x88] sm:$0xff]  ;;  %v1021_v60 = vsub.f32 %v69_v14, %v133_v30  ;;  %p956_p5 = pnand %p955_p4, %p949_p1 }
  0x2f   :  { %v78_v34 = vld [vmem:[#allocation3 + $0x90] sm:$0xff]  ;;  %v79_v35 = vld [vmem:[#allocation3 + $0x98] sm:$0xff]  ;;  %v136_v37 = vld [vmem:[#allocation6 + $0x60] sm:$0xff]  ;;  %v1019_v59 = vsub.f32 %v68_v13, %v132_v29  ;;  %v1023_v61 = vsub.f32 %v70_v15, %v134_v31  ;;  %1599 = vst [vmem:[#allocation16_spill] sm:$0xff] %v1033_v8 }
  0x30   :  { %v135_v36 = vld [vmem:[#allocation6 + $0x58] sm:$0xff]  ;;  %v137_v38 = vld [vmem:[#allocation6 + $0x68] sm:$0xff]  ;;  %v80_v43 = vld [vmem:[#allocation3 + $0xa0] sm:$0xff]  ;;  %v1029_v6 = vsub.f32 %v72_v20, %v136_v37 }
  0x31   :  { %v81_v44 = vld [vmem:[#allocation3 + $0xa8] sm:$0xff]  ;;  %v82_v45 = vld [vmem:[#allocation3 + $0xb0] sm:$0xff]  ;;  %v139_v47 = vld [vmem:[#allocation6 + $0x78] sm:$0xff]  ;;  %v1027_v5 = vsub.f32 %v71_v19, %v135_v36  ;;  %v1031_v7 = vsub.f32 %v73_v21, %v137_v38  ;;  %v1041_v19 = vmul.f32 %v190_v39, %v190_v39 }
  0x32   :  { %v138_v46 = vld [vmem:[#allocation6 + $0x70] sm:$0xff]  ;;  %v140_v48 = vld [vmem:[#allocation6 + $0x80] sm:$0xff]  ;;  %v83_v53 = vld [vmem:[#allocation3 + $0xb8] sm:$0xff]  ;;  %v1037_v17 = vsub.f32 %v75_v27, %v139_v47 }
  0x33   :  { %v84_v54 = vld [vmem:[#allocation3 + $0xc0] sm:$0xff]  ;;  %v85_v55 = vld [vmem:[#allocation3 + $0xc8] sm:$0xff]  ;;  %v142_v57 = vld [vmem:[#allocation6 + $0x90] sm:$0xff]  ;;  %v1035_v16 = vsub.f32 %v74_v26, %v138_v46  ;;  %v1039_v18 = vsub.f32 %v76_v28, %v140_v48  ;;  %1600 = vst [vmem:[#allocation17_spill] sm:$0xff] %v1041_v19  ;;  %v1049_v26 = vmul.f32 %v191_v40, %v191_v40 }
  0x34   :  { %v141_v56 = vld [vmem:[#allocation6 + $0x88] sm:$0xff]  ;;  %v143_v58 = vld [vmem:[#allocation6 + $0x98] sm:$0xff]  ;;  %v86_v63 = vld [vmem:[#allocation3 + $0xd0] sm:$0xff]  ;;  %v1045_v30 = vsub.f32 %v78_v34, %v142_v57 }
  0x35   :  { %v87_v0 = vld [vmem:[#allocation3 + $0xd8] sm:$0xff]  ;;  %v88_v1 = vld [vmem:[#allocation3 + $0xe0] sm:$0xff]  ;;  %v145_v3 = vld [vmem:[#allocation6 + $0xa8] sm:$0xff]  ;;  %v1043_v29 = vsub.f32 %v77_v33, %v141_v56  ;;  %v1047_v31 = vsub.f32 %v79_v35, %v143_v58  ;;  %1601 = vst [vmem:[#allocation18_spill] sm:$0xff] %v1049_v26  ;;  %v1057_v33 = vmul.f32 %v192_v49, %v192_v49 }
  0x36   :  { %v144_v2 = vld [vmem:[#allocation6 + $0xa0] sm:$0xff]  ;;  %v146_v4 = vld [vmem:[#allocation6 + $0xb0] sm:$0xff]  ;;  %v89_v9 = vld [vmem:[#allocation3 + $0xe8] sm:$0xff]  ;;  %v1053_v46 = vsub.f32 %v81_v44, %v145_v3 }
  0x37   :  { %v90_v10 = vld [vmem:[#allocation3 + $0xf0] sm:$0xff]  ;;  %v91_v12 = vld [vmem:[#allocation3 + $0xf8] sm:$0xff]  ;;  %v148_v14 = vld [vmem:[#allocation6 + $0xc0] sm:$0xff]  ;;  %v1051_v39 = vsub.f32 %v80_v43, %v144_v2  ;;  %v1055_v47 = vsub.f32 %v82_v45, %v146_v4  ;;  %1602 = vst [vmem:[#allocation19_spill] sm:$0xff] %v1057_v33  ;;  %v1065_v43 = vmul.f32 %v193_v50, %v193_v50 }
  0x38   :  { %v147_v13 = vld [vmem:[#allocation6 + $0xb8] sm:$0xff]  ;;  %v149_v15 = vld [vmem:[#allocation6 + $0xc8] sm:$0xff]  ;;  %v92_v20 = vld [vmem:[#allocation3 + $0x100] sm:$0xff]  ;;  %v1061_v41 = vsub.f32 %v84_v54, %v148_v14 }
  0x39   :  { %v93_v22 = vld [vmem:[#allocation3 + $0x108] sm:$0xff]  ;;  %v94_v21 = vld [vmem:[#allocation3 + $0x110] sm:$0xff]  ;;  %v151_v24 = vld [vmem:[#allocation6 + $0xd8] sm:$0xff]  ;;  %v1059_v58 = vsub.f32 %v83_v53, %v147_v13  ;;  %v1063_v11 = vsub.f32 %v85_v55, %v149_v15  ;;  %1603 = vst [vmem:[#allocation20_spill] sm:$0xff] %v1065_v43  ;;  %v1075_v53 = vmul.f32 %v1015_v51, %v1015_v51 }
  0x3a   :  { %v150_v23 = vld [vmem:[#allocation6 + $0xd0] sm:$0xff]  ;;  %v152_v25 = vld [vmem:[#allocation6 + $0xe0] sm:$0xff]  ;;  %v95_v27 = vld [vmem:[#allocation3 + $0x118] sm:$0xff]  ;;  %v1069_v33 = vsub.f32 %v87_v0, %v151_v24  ;;  %v1085_v0 = vmul.f32 %v1017_v52, %v1017_v52 }
  0x3b   :  { %v96_v32 = vld [vmem:[#allocation3 + $0x120] sm:$0xff]  ;;  %v97_v28 = vld [vmem:[#allocation3 + $0x128] sm:$0xff]  ;;  %v154_v37 = vld [vmem:[#allocation6 + $0xf0] sm:$0xff]  ;;  %v1067_v42 = vsub.f32 %v86_v63, %v150_v23  ;;  %v1071_v26 = vsub.f32 %v88_v1, %v152_v25  ;;  %1604 = vst [vmem:[#allocation21_spill] sm:$0xff] %v1075_v53 }
  0x3c   :  { %v153_v36 = vld [vmem:[#allocation6 + $0xe8] sm:$0xff]  ;;  %v155_v38 = vld [vmem:[#allocation6 + $0xf8] sm:$0xff]  ;;  %v98_v34 = vld [vmem:[#allocation3 + $0x130] sm:$0xff]  ;;  %v1079_v19 = vsub.f32 %v90_v10, %v154_v37  ;;  %1607 = vst [vmem:[#allocation24_spill] sm:$0xff] %v1085_v0  ;;  %v1095_v10 = vmul.f32 %v1019_v59, %v1019_v59 }
  0x3d   :  { %v99_v48 = vld [vmem:[#allocation3 + $0x138] sm:$0xff]  ;;  %v100_v35 = vld [vmem:[#allocation3 + $0x140] sm:$0xff]  ;;  %v157_v40 = vld [vmem:[#allocation6 + $0x108] sm:$0xff]  ;;  %v1077_v43 = vsub.f32 %v89_v9, %v153_v36  ;;  %v1081_v63 = vsub.f32 %v91_v12, %v155_v38 }
  0x3e   :  { %v156_v56 = vld [vmem:[#allocation6 + $0x100] sm:$0xff]  ;;  %v158_v57 = vld [vmem:[#allocation6 + $0x110] sm:$0xff]  ;;  %v101_v44 = vld [vmem:[#allocation3 + $0x148] sm:$0xff]  ;;  %1605 = vst [vmem:[#allocation22_spill] sm:$0xff] %v1079_v19  ;;  %v1089_v62 = vsub.f32 %v93_v22, %v157_v40  ;;  %v1105_v22 = vmul.f32 %v1021_v60, %v1021_v60 }
  0x3f   :  { %v102_v2 = vld [vmem:[#allocation3 + $0x150] sm:$0xff]  ;;  %v103_v45 = vld [vmem:[#allocation3 + $0x158] sm:$0xff]  ;;  %v160_v49 = vld [vmem:[#allocation6 + $0x120] sm:$0xff]  ;;  %1606 = vst [vmem:[#allocation23_spill] sm:$0xff] %v1081_v63  ;;  %v1087_v8 = vsub.f32 %v92_v20, %v156_v56  ;;  %v1091_v9 = vsub.f32 %v94_v21, %v158_v57 }
  0x40   :  { %v159_v3 = vld [vmem:[#allocation6 + $0x118] sm:$0xff]  ;;  %v161_v4 = vld [vmem:[#allocation6 + $0x128] sm:$0xff]  ;;  %v104_v54 = vld [vmem:[#allocation3 + $0x160] sm:$0xff]  ;;  %1608 = vst [vmem:[#allocation25_spill] sm:$0xff] %v1089_v62  ;;  %v1099_v19 = vsub.f32 %v96_v32, %v160_v49  ;;  %v1115_v32 = vmul.f32 %v1023_v61, %v1023_v61 }
  0x41   :  { %v105_v55 = vld [vmem:[#allocation3 + $0x168] sm:$0xff]  ;;  %v106_v50 = vld [vmem:[#allocation3 + $0x170] sm:$0xff]  ;;  %v163_v14 = vld [vmem:[#allocation6 + $0x138] sm:$0xff]  ;;  %1609 = vst [vmem:[#allocation26_spill] sm:$0xff] %v1091_v9  ;;  %v1097_v63 = vsub.f32 %v95_v27, %v159_v3  ;;  %v1101_v20 = vsub.f32 %v97_v28, %v161_v4 }
  0x42   :  { %v162_v13 = vld [vmem:[#allocation6 + $0x130] sm:$0xff]  ;;  %v164_v15 = vld [vmem:[#allocation6 + $0x140] sm:$0xff]  ;;  %v107_v1 = vld [vmem:[#allocation3 + $0x178] sm:$0xff]  ;;  %1610 = vst [vmem:[#allocation27_spill] sm:$0xff] %v1095_v10  ;;  %v1109_v62 = vsub.f32 %v99_v48, %v163_v14  ;;  %v1125_v48 = vmul.f32 %v1027_v5, %v1027_v5 }
  0x43   :  { %v108_v23 = vld [vmem:[#allocation3 + $0x180] sm:$0xff]  ;;  %v109_v51 = vld [vmem:[#allocation3 + $0x188] sm:$0xff]  ;;  %v166_v25 = vld [vmem:[#allocation6 + $0x150] sm:$0xff]  ;;  %1611 = vst [vmem:[#allocation28_spill] sm:$0xff] %v1099_v19  ;;  %v1107_v9 = vsub.f32 %v98_v34, %v162_v13  ;;  %v1111_v27 = vsub.f32 %v100_v35, %v164_v15 }
  0x44   :  { %v165_v24 = vld [vmem:[#allocation6 + $0x148] sm:$0xff]  ;;  %v167_v53 = vld [vmem:[#allocation6 + $0x158] sm:$0xff]  ;;  %v110_v12 = vld [vmem:[#allocation3 + $0x190] sm:$0xff]  ;;  %1612 = vst [vmem:[#allocation29_spill] sm:$0xff] %v1101_v20  ;;  %v1119_v19 = vsub.f32 %v102_v2, %v166_v25  ;;  %v1135_v2 = vmul.f32 %v1029_v6, %v1029_v6  ;;  %v1145_v6 = vmul.f32 %v1035_v16, %v1035_v16  ;;  %v268_v16 = vmul.f32 %v1039_v18, %v1039_v18 }
  0x45   :  { %v111_v36 = vld [vmem:[#allocation3 + $0x198] sm:$0xff]  ;;  %v112_v52 = vld [vmem:[#allocation3 + $0x1a0] sm:$0xff]  ;;  %v169_v38 = vld [vmem:[#allocation6 + $0x168] sm:$0xff]  ;;  %1613 = vst [vmem:[#allocation30_spill] sm:$0xff] %v1105_v22  ;;  %v1117_v20 = vsub.f32 %v101_v44, %v165_v24  ;;  %v1121_v34 = vsub.f32 %v103_v45, %v167_v53  ;;  %v272_v18 = vmul.f32 %v1051_v39, %v1051_v39  ;;  %v1197_v39 = vmul.f32 %v1069_v33, %v1069_v33 }
  0x46   :  { %v168_v37 = vld [vmem:[#allocation6 + $0x160] sm:$0xff]  ;;  %v170_v0 = vld [vmem:[#allocation6 + $0x170] sm:$0xff]  ;;  %v113_v21 = vld [vmem:[#allocation3 + $0x1a8] sm:$0xff]  ;;  %1614 = vst [vmem:[#allocation31_spill] sm:$0xff] %v1109_v62  ;;  %v1129_v62 = vsub.f32 %v105_v55, %v169_v38  ;;  %v284_v33 = vmul.f32 %v1087_v8, %v1087_v8 }
  0x47   :  { %v114_v56 = vld [vmem:[#allocation3 + $0x1b0] sm:$0xff]  ;;  %v115_v59 = vld [vmem:[#allocation3 + $0x1b8] sm:$0xff]  ;;  %v172_v57 = vld [vmem:[#allocation6 + $0x180] sm:$0xff]  ;;  %1615 = vst [vmem:[#allocation32_spill] sm:$0xff] %v1111_v27  ;;  %v1127_v27 = vsub.f32 %v104_v54, %v168_v37  ;;  %v1131_v44 = vsub.f32 %v106_v50, %v170_v0  ;;  %v1141_v54 = vmul.f32 %v1031_v7, %v1031_v7  ;;  %v1149_v7 = vmul.f32 %v1037_v17, %v1037_v17 }
  0x48   :  { %v171_v40 = vld [vmem:[#allocation6 + $0x178] sm:$0xff]  ;;  %v173_v10 = vld [vmem:[#allocation6 + $0x188] sm:$0xff]  ;;  %1616 = vst [vmem:[#allocation33_spill] sm:$0xff] %v1115_v32  ;;  %v116_v28 = vld [vmem:[#allocation3 + $0x1c0] sm:$0xff] }
  0x49   :  { %v117_v3 = vld [vmem:[#allocation3 + $0x1c8] sm:$0xff]  ;;  %v118_v60 = vld [vmem:[#allocation3 + $0x1d0] sm:$0xff]  ;;  %v175_v4 = vld [vmem:[#allocation6 + $0x198] sm:$0xff]  ;;  %1617 = vst [vmem:[#allocation34_spill] sm:$0xff] %v1121_v34  ;;  %v1137_v25 = vsub.f32 %v107_v1, %v171_v40  ;;  %v237_v34 = vsub.f32 %v109_v51, %v173_v10 }
  0x4a   :  { %v174_v49 = vld [vmem:[#allocation6 + $0x190] sm:$0xff]  ;;  %v176_v22 = vld [vmem:[#allocation6 + $0x1a0] sm:$0xff]  ;;  %1618 = vst [vmem:[#allocation35_spill] sm:$0xff] %v1125_v48  ;;  %v119_v35 = vld [vmem:[#allocation3 + $0x1d8] sm:$0xff]  ;;  %v236_v48 = vsub.f32 %v108_v23, %v172_v57  ;;  %v239_v38 = vsub.f32 %v111_v36, %v175_v4 }
  0x4b   :  { %v120_v13 = vld [vmem:[#allocation3 + $0x1e0] sm:$0xff]  ;;  %v121_v61 = vld [vmem:[#allocation3 + $0x1e8] sm:$0xff]  ;;  %v178_v15 = vld [vmem:[#allocation6 + $0x1b0] sm:$0xff]  ;;  %1619 = vst [vmem:[#allocation36_spill] sm:$0xff] %v1129_v62  ;;  %v238_v0 = vsub.f32 %v110_v12, %v174_v49 }
  0x4c   :  { %v177_v14 = vld [vmem:[#allocation6 + $0x1a8] sm:$0xff]  ;;  %v179_v32 = vld [vmem:[#allocation6 + $0x1b8] sm:$0xff]  ;;  %1620 = vst [vmem:[#allocation37_spill] sm:$0xff] %v1131_v44  ;;  %1621 = vst [vmem:[#allocation38_spill] sm:$0xff] %v1135_v2  ;;  %v240_v44 = vsub.f32 %v112_v52, %v176_v22  ;;  %v242_v23 = vsub.f32 %v114_v56, %v178_v15  ;;  %v290_v15 = vmul.f32 %v1107_v9, %v1107_v9 }
  0x4d   :  { %v122_v45 = vld [vmem:[#allocation3 + $0x1f0] sm:$0xff]  ;;  %v180_v53 = vld [vmem:[#allocation6 + $0x1c0] sm:$0xff]  ;;  %v181_v5 = vld [vmem:[#allocation6 + $0x1c8] sm:$0xff]  ;;  %v241_v40 = vsub.f32 %v113_v21, %v177_v14  ;;  %v243_v51 = vsub.f32 %v115_v59, %v179_v32  ;;  %1622 = vst [vmem:[#allocation39_spill] sm:$0xff] %v1149_v7  ;;  %v269_v21 = vmul.f32 %v1043_v29, %v1043_v29  ;;  %v270_v59 = vmul.f32 %v1045_v30, %v1045_v30 }
  0x4e   :  { %v182_v24 = vld [vmem:[#allocation6 + $0x1d0] sm:$0xff]  ;;  %v183_v55 = vld [vmem:[#allocation6 + $0x1d8] sm:$0xff]  ;;  %v184_v37 = vld [vmem:[#allocation6 + $0x1e0] sm:$0xff]  ;;  %v1151_v10 = vsub.f32 %v116_v28, %v180_v53  ;;  %v1153_v57 = vsub.f32 %v117_v3, %v181_v5  ;;  %v271_v32 = vmul.f32 %v1047_v31, %v1047_v31  ;;  %v273_v28 = vmul.f32 %v1053_v46, %v1053_v46 }
  0x4f   :  { %v185_v50 = vld [vmem:[#allocation6 + $0x1e8] sm:$0xff]  ;;  %v123_v2 = vld [vmem:[#allocation3 + $0x1f8] sm:$0xff]  ;;  %v186_v62 = vld [vmem:[#allocation6 + $0x1f0] sm:$0xff]  ;;  %v1155_v12 = vsub.f32 %v118_v60, %v182_v24  ;;  %v1159_v36 = vsub.f32 %v119_v35, %v183_v55  ;;  %v1161_v52 = vsub.f32 %v120_v13, %v184_v37  ;;  %v274_v3 = vmul.f32 %v1055_v47, %v1055_v47 }
  0x50   :  { %v187_v1 = vld [vmem:[#allocation6 + $0x1f8] sm:$0xff]  ;;  %v1163_v22 = vsub.f32 %v121_v61, %v185_v50  ;;  %v1167_v17 = vsub.f32 %v122_v45, %v186_v62  ;;  %v275_v62 = vmul.f32 %v1059_v58, %v1059_v58  ;;  %v1185_v29 = vmul.f32 %v1061_v41, %v1061_v41  ;;  %v1625_v58 = vld [vmem:[#allocation23_spill] sm:$0xff]  ;;  %v1629_v35 = vld [vmem:[#allocation28_spill] sm:$0xff] }
  0x51   :  { %v1169_v56 = vsub.f32 %v123_v2, %v187_v1  ;;  %v1189_v30 = vmul.f32 %v1063_v11, %v1063_v11  ;;  %v1193_v31 = vmul.f32 %v1067_v42, %v1067_v42  ;;  %v1201_v46 = vmul.f32 %v1071_v26, %v1071_v26  ;;  %v1623_v47 = vld [vmem:[#allocation22_spill] sm:$0xff]  ;;  %v1627_v60 = vld [vmem:[#allocation25_spill] sm:$0xff]  ;;  %v1631_v2 = vld [vmem:[#allocation31_spill] sm:$0xff] }
  0x52   :  { %v1205_v41 = vmul.f32 %v1077_v43, %v1077_v43  ;;  %v1209_v11 = vmul.f32 %v1623_v47, %v1623_v47  ;;  %v1213_v42 = vmul.f32 %v1625_v58, %v1625_v58  ;;  %v285_v49 = vmul.f32 %v1627_v60, %v1627_v60  ;;  %v1628_v26 = vld [vmem:[#allocation26_spill] sm:$0xff]  ;;  %v1630_v61 = vld [vmem:[#allocation29_spill] sm:$0xff]  ;;  %v1632_v45 = vld [vmem:[#allocation32_spill] sm:$0xff] }
  0x53   :  { %v286_v4 = vmul.f32 %v1628_v26, %v1628_v26  ;;  %v287_v43 = vmul.f32 %v1097_v63, %v1097_v63  ;;  %v288_v13 = vmul.f32 %v1629_v35, %v1629_v35  ;;  %v289_v14 = vmul.f32 %v1630_v61, %v1630_v61  ;;  %v1635_v60 = vld [vmem:[#allocation15_spill] sm:$0xff]  ;;  %v1636_v35 = vld [vmem:[#allocation16_spill] sm:$0xff] }
  0x54   :  { %1624 = vst [vmem:[#allocation22_spill] sm:$0xff] %v1209_v11  ;;  %1626 = vst [vmem:[#allocation23_spill] sm:$0xff] %v1213_v42  ;;  %v291_v8 = vmul.f32 %v1631_v2, %v1631_v2  ;;  %v1233_v53 = vmul.f32 %v1632_v45, %v1632_v45  ;;  %v1237_v5 = vmul.f32 %v1117_v20, %v1117_v20  ;;  %v1637_v2 = vld [vmem:[#allocation17_spill] sm:$0xff]  ;;  %v1638_v20 = vld [vmem:[#allocation18_spill] sm:$0xff] }
  0x55   :  { %v1241_v63 = vmul.f32 %v1119_v19, %v1119_v19  ;;  %v300_v24 = vmul.f32 %v236_v48, %v236_v48  ;;  %v301_v55 = vmul.f32 %v237_v34, %v237_v34  ;;  %v302_v37 = vmul.f32 %v238_v0, %v238_v0  ;;  %v1639_v42 = vld [vmem:[#allocation19_spill] sm:$0xff]  ;;  %v1641_v34 = vld [vmem:[#allocation21_spill] sm:$0xff] }
  0x56   :  { %1633 = vst [vmem:[#allocation25_spill] sm:$0xff] %v1237_v5  ;;  %v303_v50 = vmul.f32 %v239_v38, %v239_v38  ;;  %v304_v9 = vmul.f32 %v240_v44, %v240_v44  ;;  %v305_v1 = vmul.f32 %v241_v40, %v241_v40  ;;  %v306_v47 = vmul.f32 %v242_v23, %v242_v23  ;;  %v1642_v38 = vld [vmem:[#allocation24_spill] sm:$0xff] }
  0x57   :  { %1634 = vst [vmem:[#allocation26_spill] sm:$0xff] %v1241_v63  ;;  %v307_v58 = vmul.f32 %v243_v51, %v243_v51  ;;  %v316_v26 = vadd.f32 %v268_v16, %v1635_v60  ;;  %v325_v61 = vadd.f32 %v269_v21, %v1636_v35  ;;  %v334_v45 = vadd.f32 %v270_v59, %v1637_v2  ;;  %v1640_v63 = vld [vmem:[#allocation20_spill] sm:$0xff] }
  0x58   :  { %v343_v5 = vadd.f32 %v271_v32, %v1638_v20  ;;  %v352_v7 = vadd.f32 %v272_v18, %v1639_v42  ;;  %v361_v48 = vadd.f32 %v273_v28, %v1640_v63  ;;  %v370_v0 = vadd.f32 %v274_v3, %v1641_v34 }
  0x59   :  { %v317_v19 = vadd.f32 %v316_v26, %v284_v33  ;;  %v379_v44 = vadd.f32 %v275_v62, %v1642_v38  ;;  %v326_v40 = vadd.f32 %v325_v61, %v285_v49  ;;  %v335_v23 = vadd.f32 %v334_v45, %v286_v4  ;;  %v1645_v45 = vld [vmem:[#allocation37_spill] sm:$0xff] }
  0x5a   :  { %v344_v51 = vadd.f32 %v343_v5, %v287_v43  ;;  %v353_v11 = vadd.f32 %v352_v7, %v288_v13  ;;  %v362_v60 = vadd.f32 %v361_v48, %v289_v14  ;;  %v371_v21 = vadd.f32 %v370_v0, %v290_v15 }
  0x5b   :  { %v318_v16 = vadd.f32 %v317_v19, %v300_v24  ;;  %v380_v35 = vadd.f32 %v379_v44, %v291_v8  ;;  %v327_v59 = vadd.f32 %v326_v40, %v301_v55  ;;  %v336_v2 = vadd.f32 %v335_v23, %v302_v37  ;;  %v1643_v37 = vld [vmem:[#allocation34_spill] sm:$0xff] }
  0x5c   :  { %v345_v32 = vadd.f32 %v344_v51, %v303_v50  ;;  %v354_v20 = vadd.f32 %v353_v11, %v304_v9  ;;  %v363_v42 = vadd.f32 %v362_v60, %v305_v1  ;;  %v372_v33 = vadd.f32 %v371_v21, %v306_v47 }
  0x5d   :  { %v319_v18 = vrot.slane %v318_v16, 4  ;;  %v381_v28 = vadd.f32 %v380_v35, %v307_v58  ;;  %v328_v63 = vrot.slane %v327_v59, 4  ;;  %v337_v3 = vrot.slane %v336_v2, 4  ;;  %v1644_v58 = vld [vmem:[#allocation36_spill] sm:$0xff] }
  0x5e   :  { %v346_v26 = vrot.slane %v345_v32, 4  ;;  %v355_v62 = vrot.slane %v354_v20, 4  ;;  %v364_v4 = vrot.slane %v363_v42, 4  ;;  %v373_v43 = vrot.slane %v372_v33, 4 }
  0x5f   :  { %v320_v49 = vadd.f32 %v319_v18, %v318_v16  ;;  %v382_v7 = vrot.slane %v381_v28, 4  ;;  %v329_v13 = vadd.f32 %v328_v63, %v327_v59  ;;  %v338_v14 = vadd.f32 %v337_v3, %v336_v2  ;;  %v1649_v3 = vld [vmem:[#allocation35_spill] sm:$0xff] }
  0x60   :  { %v347_v15 = vadd.f32 %v346_v26, %v345_v32  ;;  %v356_v8 = vadd.f32 %v355_v62, %v354_v20  ;;  %v365_v24 = vadd.f32 %v364_v4, %v363_v42  ;;  %v374_v55 = vadd.f32 %v373_v43, %v372_v33  ;;  %v1650_v62 = vld [vmem:[#allocation38_spill] sm:$0xff] }
  0x61   :  { %v321_v5 = vrot.slane %v320_v49, 2  ;;  %v383_v11 = vadd.f32 %v382_v7, %v381_v28  ;;  %v295_v50 = vmul.f32 %v1643_v37, %v1643_v37  ;;  %v296_v9 = vmul.f32 %v1127_v27, %v1127_v27  ;;  %v1648_v28 = vld [vmem:[#allocation33_spill] sm:$0xff]  ;;  %v1651_v7 = vld [vmem:[#allocation22_spill] sm:$0xff] }
  0x62   :  { %v330_v1 = vrot.slane %v329_v13, 2  ;;  %v339_v47 = vrot.slane %v338_v14, 2  ;;  %v297_v61 = vmul.f32 %v1644_v58, %v1644_v58  ;;  %v298_v19 = vmul.f32 %v1645_v45, %v1645_v45 }
  0x63   :  { %v299_v48 = vmul.f32 %v1137_v25, %v1137_v25  ;;  %v348_v34 = vrot.slane %v347_v15, 2  ;;  %v1261_v0 = vadd.f32 %v321_v5, %v320_v49  ;;  %v357_v38 = vrot.slane %v356_v8, 2 }
  0x64   :  { %v366_v44 = vrot.slane %v365_v24, 2  ;;  %v375_v40 = vrot.slane %v374_v55, 2  ;;  %v308_v27 = vmul.f32 %v1151_v10, %v1151_v10  ;;  %v1265_v23 = vadd.f32 %v330_v1, %v329_v13  ;;  %v1652_v13 = vld [vmem:[#allocation39_spill] sm:$0xff] }
  0x65   :  { %v1267_v51 = vadd.f32 %v339_v47, %v338_v14  ;;  %v384_v16 = vrot.slane %v383_v11, 2  ;;  %v309_v60 = vmul.f32 %v1153_v57, %v1153_v57  ;;  %v310_v25 = vmul.f32 %v1155_v12, %v1155_v12  ;;  %v1653_v14 = vld [vmem:[#allocation23_spill] sm:$0xff] }
  0x66   :  { %v311_v21 = vmul.f32 %v1159_v36, %v1159_v36  ;;  %v312_v35 = vmul.f32 %v1161_v52, %v1161_v52  ;;  %v313_v10 = vmul.f32 %v1163_v22, %v1163_v22  ;;  %v314_v59 = vmul.f32 %v1167_v17, %v1167_v17  ;;  %v1646_v17 = vld [vmem:[#allocation27_spill] sm:$0xff] }
  0x67   :  { %v315_v2 = vmul.f32 %v1169_v56, %v1169_v56  ;;  %v1283_v32 = vadd.f32 %v348_v34, %v347_v15  ;;  %v323_v57 = vrot.slane %v1261_v0, 1  ;;  %v1286_v12 = vadd.f32 %v357_v38, %v356_v8  ;;  %v1647_v56 = vld [vmem:[#allocation30_spill] sm:$0xff]  ;;  %v1654_v15 = vld [vmem:[#allocation25_spill] sm:$0xff] }
  0x68   :  { %v1288_v20 = vadd.f32 %v366_v44, %v365_v24  ;;  %v1290_v36 = vadd.f32 %v375_v40, %v374_v55  ;;  %v332_v52 = vrot.slane %v1265_v23, 1  ;;  %v341_v22 = vrot.slane %v1267_v51, 1 }
  0x69   :  { %v1294_v18 = vadd.f32 %v384_v16, %v383_v11  ;;  %v388_v42 = vadd.f32 %v1185_v29, %v1646_v17  ;;  %v397_v33 = vadd.f32 %v1189_v30, %v1647_v56  ;;  %v406_v63 = vadd.f32 %v1193_v31, %v1648_v28  ;;  %v1655_v31 = vld [vmem:[#allocation26_spill] sm:$0xff] }
  0x6a   :  { %v415_v26 = vadd.f32 %v1197_v39, %v1649_v3  ;;  %v424_v49 = vadd.f32 %v1201_v46, %v1650_v62  ;;  %v433_v43 = vadd.f32 %v1205_v41, %v1141_v54  ;;  %v442_v29 = vadd.f32 %v1651_v7, %v1145_v6 }
  0x6b   :  { %v389_v4 = vadd.f32 %v388_v42, %v1233_v53  ;;  %v451_v30 = vadd.f32 %v1653_v14, %v1652_v13  ;;  %v398_v8 = vadd.f32 %v397_v33, %v1654_v15  ;;  %v407_v5 = vadd.f32 %v406_v63, %v1655_v31 }
  0x6c   :  { %v416_v24 = vadd.f32 %v415_v26, %v295_v50  ;;  %v425_v39 = vadd.f32 %v424_v49, %v296_v9  ;;  %v434_v11 = vadd.f32 %v433_v43, %v297_v61  ;;  %v443_v46 = vadd.f32 %v442_v29, %v298_v19 }
  0x6d   :  { %v390_v55 = vadd.f32 %v389_v4, %v308_v27  ;;  %v452_v37 = vadd.f32 %v451_v30, %v299_v48  ;;  %v399_v53 = vadd.f32 %v398_v8, %v309_v60  ;;  %v408_v1 = vadd.f32 %v407_v5, %v310_v25 }
  0x6e   :  { %v417_v47 = vadd.f32 %v416_v24, %v311_v21  ;;  %v426_v54 = vadd.f32 %v425_v39, %v312_v35  ;;  %v435_v58 = vadd.f32 %v434_v11, %v313_v10  ;;  %v444_v6 = vadd.f32 %v443_v46, %v314_v59 }
  0x6f   :  { %v391_v41 = vrot.slane %v390_v55, 4  ;;  %v453_v45 = vadd.f32 %v452_v37, %v315_v2  ;;  %v400_v34 = vrot.slane %v399_v53, 4  ;;  %v409_v38 = vrot.slane %v408_v1, 4  ;;  %v1656_v37 = vld [vmem:[#allocation14_spill] sm:$0xff] }
  0x70   :  { %v418_v44 = vrot.slane %v417_v47, 4  ;;  %v427_v40 = vrot.slane %v426_v54, 4  ;;  %v436_v17 = vrot.slane %v435_v58, 4  ;;  %v445_v50 = vrot.slane %v444_v6, 4 }
  0x71   :  { %v392_v16 = vadd.f32 %v391_v41, %v390_v55  ;;  %v454_v9 = vrot.slane %v453_v45, 4  ;;  %v401_v27 = vadd.f32 %v400_v34, %v399_v53  ;;  %v410_v61 = vadd.f32 %v409_v38, %v408_v1  ;;  %v1657_v53 = vld [vmem:[#allocation13_spill] sm:$0xff] }
  0x72   :  { %v419_v19 = vadd.f32 %v418_v44, %v417_v47  ;;  %v428_v48 = vadd.f32 %v427_v40, %v426_v54  ;;  %v437_v25 = vadd.f32 %v436_v17, %v435_v58  ;;  %v446_v21 = vadd.f32 %v445_v50, %v444_v6 }
  0x73   :  { %v393_v60 = vrot.slane %v392_v16, 2  ;;  %v455_v35 = vadd.f32 %v454_v9, %v453_v45  ;;  %v402_v42 = vrot.slane %v401_v27, 2  ;;  %v411_v10 = vrot.slane %v410_v61, 2 }
  0x74   :  { %v420_v59 = vrot.slane %v419_v19, 2  ;;  %v429_v2 = vrot.slane %v428_v48, 2  ;;  %v350_v56 = vrot.slane %v1283_v32, 1  ;;  %v438_v33 = vrot.slane %v437_v25, 2 }
  0x75   :  { %v447_v28 = vrot.slane %v446_v21, 2  ;;  %v456_v63 = vrot.slane %v455_v35, 2  ;;  %v359_v3 = vrot.slane %v1286_v12, 1  ;;  %v394_v26 = vadd.f32 %v393_v60, %v392_v16 }
  0x76   :  { %v403_v62 = vadd.f32 %v402_v42, %v401_v27  ;;  %v412_v49 = vadd.f32 %v411_v10, %v410_v61  ;;  %v1318_v4 = vadd.f32 %v323_v57, %v1261_v0  ;;  %v421_v43 = vadd.f32 %v420_v59, %v419_v19 }
  0x77   :  { %v430_v7 = vadd.f32 %v429_v2, %v428_v48  ;;  %v439_v29 = vadd.f32 %v438_v33, %v437_v25  ;;  %v1321_v13 = vadd.f32 %v332_v52, %v1265_v23  ;;  %v368_v14 = vrot.slane %v1288_v20, 1 }
  0x78   :  { %v448_v30 = vadd.f32 %v447_v28, %v446_v21  ;;  %v457_v15 = vadd.f32 %v456_v63, %v455_v35  ;;  %v1327_v8 = vadd.f32 %v341_v22, %v1267_v51  ;;  %v1330_v31 = vadd.f32 %v350_v56, %v1283_v32 }
  0x79   :  { %v377_v0 = vrot.slane %v1290_v36, 1  ;;  %v386_v57 = vrot.slane %v1294_v18, 1  ;;  %v1335_v5 = vadd.f32 %v359_v3, %v1286_v12  ;;  %v395_v23 = vrot.slane %v394_v26, 1 }
  0x7a   :  { %v404_v52 = vrot.slane %v403_v62, 1  ;;  %v413_v24 = vrot.slane %v412_v49, 1  ;;  %v422_v39 = vrot.slane %v421_v43, 1  ;;  %v431_v55 = vrot.slane %v430_v7, 1 }
  0x7b   :  { %v440_v11 = vrot.slane %v439_v29, 1  ;;  %856 = vrsqrt.f32 %v1318_v4  ;;  %v1339_v51 = vadd.f32 %v368_v14, %v1288_v20  ;;  %v449_v32 = vrot.slane %v448_v30, 1 }
  0x7c   :  { %v458_v22 = vrot.slane %v457_v15, 1  ;;  %858 = vrsqrt.f32 %v1321_v13  ;;  %v1343_v46 = vadd.f32 %v377_v0, %v1290_v36  ;;  %v1346_v12 = vadd.f32 %v386_v57, %v1294_v18 }
  0x7d   :  { %860 = vrsqrt.f32 %v1327_v8  ;;  %v1658_v1 = vunpack.c.0.s8 %v1657_v53  ;;  %v1354_v54 = vadd.f32 %v395_v23, %v394_v26  ;;  %v1356_v20 = vadd.f32 %v404_v52, %v403_v62 }
  0x7e   :  { %v1358_v41 = vadd.f32 %v413_v24, %v412_v49  ;;  %862 = vrsqrt.f32 %v1330_v31  ;;  %v1361_v36 = vadd.f32 %v422_v39, %v421_v43  ;;  %v1363_v58 = vadd.f32 %v431_v55, %v430_v7 }
  0x7f   :  { %v1352_v47 = vsub.s32 %v1658_v1, %v1656_v37  ;;  %v1365_v18 = vadd.f32 %v440_v11, %v439_v29  ;;  %864 = vrsqrt.f32 %v1335_v5  ;;  %v1368_v6 = vadd.f32 %v449_v32, %v448_v30 }
  0x80   :  { %v1370_v45 = vadd.f32 %v458_v22, %v457_v15  ;;  %vm464_vm0 = vcmp.eq.f32.partialorder %v1318_v4, inf  ;;  %866 = vrsqrt.f32 %v1339_v51  ;;  %vm466_vm1 = vcmp.eq.f32.partialorder %v1318_v4, 0.0 }
  0x81   :  { %v467_v34 = vand.u32 2147483648, %v1318_v4  ;;  %vm471_vm2 = vcmp.eq.f32.partialorder %v1321_v13, inf  ;;  %868 = vrsqrt.f32 %v1343_v46  ;;  %vm473_vm3 = vcmp.eq.f32.partialorder %v1321_v13, 0.0 }
  0x82   :  { %v474_v38 = vand.u32 2147483648, %v1321_v13  ;;  %vm478_vm4 = vcmp.eq.f32.partialorder %v1327_v8, inf  ;;  %870 = vrsqrt.f32 %v1346_v12  ;;  %vm480_vm5 = vcmp.eq.f32.partialorder %v1327_v8, 0.0 }
  0x83   :  { %v481_v44 = vand.u32 2147483648, %v1327_v8  ;;  %vm485_vm6 = vcmp.eq.f32.partialorder %v1330_v31, inf  ;;  %872 = vrsqrt.f32 %v1354_v54  ;;  %vm487_vm7 = vcmp.eq.f32.partialorder %v1330_v31, 0.0 }
  0x84   :  { %v488_v40 = vand.u32 2147483648, %v1330_v31  ;;  %vm492_vm8 = vcmp.eq.f32.partialorder %v1335_v5, inf  ;;  %874 = vrsqrt.f32 %v1356_v20  ;;  %vm494_vm9 = vcmp.eq.f32.partialorder %v1335_v5, 0.0 }
  0x85   :  { %v495_v16 = vand.u32 2147483648, %v1335_v5  ;;  %vm499_vm10 = vcmp.eq.f32.partialorder %v1339_v51, inf  ;;  %876 = vrsqrt.f32 %v1358_v41  ;;  %v502_v17 = vand.u32 2147483648, %v1339_v51 }
  0x86   :  { %vm506_vm12 = vcmp.eq.f32.partialorder %v1343_v46, inf  ;;  %878 = vrsqrt.f32 %v1361_v36  ;;  %v509_v50 = vand.u32 2147483648, %v1343_v46  ;;  %v516_v27 = vand.u32 2147483648, %v1346_v12 }
  0x87   :  { %880 = vrsqrt.f32 %v1363_v58  ;;  %v523_v48 = vand.u32 2147483648, %v1354_v54  ;;  %v530_v60 = vand.u32 2147483648, %v1356_v20  ;;  %vm529_vm15 = vcmp.eq.f32.partialorder %v1356_v20, 0.0 }
  0x88   :  { %v857_v9 = vpop.eup %856  ;;  %882 = vrsqrt.f32 %v1365_v18  ;;  %vm534_vm11 = vcmp.eq.f32.partialorder %v1358_v41, inf  ;;  %v537_v35 = vand.u32 2147483648, %v1358_v41  ;;  %v544_v42 = vand.u32 2147483648, %v1361_v36 }
  0x89   :  { %v859_v61 = vpop.eup %858  ;;  %v463_v19 = vmul.f32 %v857_v9, %v1318_v4  ;;  %884 = vrsqrt.f32 %v1368_v6  ;;  %vm541_vm13 = vcmp.eq.f32.partialorder %v1361_v36, inf  ;;  %v551_v56 = vand.u32 2147483648, %v1363_v58 }
  0x8a   :  { %v861_v25 = vpop.eup %860  ;;  %v470_v21 = vmul.f32 %v859_v61, %v1321_v13  ;;  %886 = vrsqrt.f32 %v1370_v45  ;;  %vm548_vm14 = vcmp.eq.f32.partialorder %v1363_v58, inf  ;;  %v558_v26 = vand.u32 2147483648, %v1365_v18 }
  0x8b   :  { %v863_v10 = vpop.eup %862  ;;  %v465_v59 = vsel %vm464_vm0, %v1318_v4, %v463_v19  ;;  %v477_v2 = vmul.f32 %v861_v25, %v1327_v8  ;;  %vm543_vm0 = vcmp.eq.f32.partialorder %v1361_v36, 0.0  ;;  %v565_v7 = vand.u32 2147483648, %v1368_v6 }
  0x8c   :  { %v865_v33 = vpop.eup %864  ;;  %v468_v28 = vsel %vm466_vm1, %v467_v34, %v465_v59  ;;  %v472_v63 = vsel %vm471_vm2, %v1321_v13, %v470_v21  ;;  %v484_v3 = vmul.f32 %v863_v10, %v1330_v31  ;;  %vm550_vm1 = vcmp.eq.f32.partialorder %v1363_v58, 0.0 }
  0x8d   :  { %v867_v62 = vpop.eup %866  ;;  %v475_v49 = vsel %vm473_vm3, %v474_v38, %v472_v63  ;;  %v479_v4 = vsel %vm478_vm4, %v1327_v8, %v477_v2  ;;  %v491_v43 = vmul.f32 %v865_v33, %v1335_v5  ;;  %vm555_vm2 = vcmp.eq.f32.partialorder %v1365_v18, inf }
  0x8e   :  { %v869_v29 = vpop.eup %868  ;;  %v482_v14 = vsel %vm480_vm5, %v481_v44, %v479_v4  ;;  %v486_v13 = vsel %vm485_vm6, %v1330_v31, %v484_v3  ;;  %v498_v30 = vmul.f32 %v867_v62, %v1339_v51  ;;  %vm557_vm3 = vcmp.eq.f32.partialorder %v1365_v18, 0.0 }
  0x8f   :  { %v572_v15 = vand.u32 2147483648, %v1370_v45  ;;  %v871_v0 = vpop.eup %870  ;;  %v489_v57 = vsel %vm487_vm7, %v488_v40, %v486_v13  ;;  %v493_v23 = vsel %vm492_vm8, %v1335_v5, %v491_v43  ;;  %v505_v8 = vmul.f32 %v869_v29, %v1343_v46 }
  0x90   :  { %vm562_vm4 = vcmp.eq.f32.partialorder %v1368_v6, inf  ;;  %v590_v52 = vcombine.low %v468_v28, %v475_v49  ;;  %v873_v24 = vpop.eup %872  ;;  %v496_v39 = vsel %vm494_vm9, %v495_v16, %v493_v23  ;;  %v500_v31 = vsel %vm499_vm10, %v1339_v51, %v498_v30 }
  0x91   :  { %v512_v55 = vmul.f32 %v871_v0, %v1346_v12  ;;  %vm564_vm5 = vcmp.eq.f32.partialorder %v1368_v6, 0.0  ;;  %vm569_vm6 = vcmp.eq.f32.partialorder %v1370_v45, inf  ;;  %v591_v11 = vcombine.low %v482_v14, %v489_v57  ;;  %v875_v32 = vpop.eup %874  ;;  %v460_v57 = vld [vmem:[#allocation8] sm:$0xff] }
  0x92   :  { %vm1659_vm7 = vcmp.eq.f32.partialorder %v1339_v51, 0.0  ;;  %v507_v5 = vsel %vm506_vm12, %v1343_v46, %v505_v8  ;;  %v519_v53 = vmul.f32 %v873_v24, %v1354_v54  ;;  %vm571_vm8 = vcmp.eq.f32.partialorder %v1370_v45, 0.0  ;;  %v877_v34 = vpop.eup %876 }
  0x93   :  { %v503_v22 = vsel %vm1659_vm7, %v502_v17, %v500_v31  ;;  %v600_v1 = vrot.slane %v590_v52, %v1352_v47  ;;  %vm1660_vm9 = vcmp.eq.f32.partialorder %v1343_v46, 0.0  ;;  %vm1661_vm10 = vcmp.eq.f32.partialorder %v1346_v12, inf  ;;  %v879_v16 = vpop.eup %878 }
  0x94   :  { %v510_v38 = vsel %vm1660_vm9, %v509_v50, %v507_v5  ;;  %v514_v51 = vsel %vm1661_vm10, %v1346_v12, %v512_v55  ;;  %v526_v44 = vmul.f32 %v875_v32, %v1356_v20  ;;  %v592_v40 = vcombine.low %v496_v39, %v503_v22  ;;  %v881_v61 = vpop.eup %880 }
  0x95   :  { %vm1662_vm12 = vcmp.eq.f32.partialorder %v1346_v12, 0.0  ;;  %vm1663_vm7 = vcmp.eq.f32.partialorder %v1354_v54, inf  ;;  %v533_v46 = vmul.f32 %v877_v34, %v1358_v41  ;;  %v607_v50 = vrot.slane %v591_v11, %v1352_v47  ;;  %v883_v21 = vpop.eup %882 }
  0x96   :  { %v517_v17 = vsel %vm1662_vm12, %v516_v27, %v514_v51  ;;  %v521_v9 = vsel %vm1663_vm7, %v1354_v54, %v519_v53  ;;  %vm1664_vm9 = vcmp.eq.f32.partialorder %v1354_v54, 0.0  ;;  %vm1665_vm10 = vcmp.eq.f32.partialorder %v1356_v20, inf  ;;  %v885_v28 = vpop.eup %884 }
  0x97   :  { %v524_v19 = vsel %vm1664_vm9, %v523_v48, %v521_v9  ;;  %v528_v25 = vsel %vm1665_vm10, %v1356_v20, %v526_v44  ;;  %v540_v12 = vmul.f32 %v879_v16, %v1361_v36  ;;  %v593_v27 = vcombine.low %v510_v38, %v517_v17  ;;  %v887_v62 = vpop.eup %886 }
  0x98   :  { %v531_v10 = vsel %vm529_vm15, %v530_v60, %v528_v25  ;;  %v535_v59 = vsel %vm534_vm11, %v1358_v41, %v533_v46  ;;  %v547_v54 = vmul.f32 %v881_v61, %v1363_v58  ;;  %v614_v48 = vrot.slane %v592_v40, %v1352_v47  ;;  %v461_v40 = vld [vmem:[#allocation8 + $0x8] sm:$0xff] }
  0x99   :  { %vm1666_vm12 = vcmp.eq.f32.partialorder %v1358_v41, 0.0  ;;  %v542_v33 = vsel %vm541_vm13, %v1361_v36, %v540_v12  ;;  %v554_v20 = vmul.f32 %v883_v21, %v1365_v18  ;;  %v621_v60 = vrot.slane %v593_v27, %v1352_v47 }
  0x9a   :  { %v538_v2 = vsel %vm1666_vm12, %v537_v35, %v535_v59  ;;  %v545_v63 = vsel %vm543_vm0, %v544_v42, %v542_v33  ;;  %v549_v3 = vsel %vm548_vm14, %v1363_v58, %v547_v54  ;;  %v622_v41 = vcombine.low %v600_v1, %v607_v50 }
  0x9b   :  { %v639_v35 = vcombine.low %v524_v19, %v531_v10  ;;  %v552_v49 = vsel %vm550_vm1, %v551_v56, %v549_v3  ;;  %v556_v4 = vsel %vm555_vm2, %v1365_v18, %v554_v20  ;;  %v561_v43 = vmul.f32 %v885_v28, %v1368_v6 }
  0x9c   :  { %v623_v36 = vcombine.low %v614_v48, %v621_v60  ;;  %v559_v42 = vsel %vm557_vm3, %v558_v26, %v556_v4  ;;  %v568_v29 = vmul.f32 %v887_v62, %v1370_v45  ;;  %v630_v14 = vrot.slane %v622_v41, %v1352_v47 }
  0x9d   :  { %v640_v13 = vcombine.low %v538_v2, %v545_v63  ;;  %v563_v58 = vsel %vm562_vm4, %v1368_v6, %v561_v43  ;;  %v641_v30 = vcombine.low %v552_v49, %v559_v42  ;;  %v649_v0 = vrot.slane %v639_v35, %v1352_v47 }
  0x9e   :  { %v637_v56 = vrot.slane %v623_v36, %v1352_v47  ;;  %v566_v18 = vsel %vm564_vm5, %v565_v7, %v563_v58  ;;  %v570_v26 = vsel %vm569_vm6, %v1370_v45, %v568_v29  ;;  %v709_v55 = vsub.s32 0, %v1656_v37 }
  0x9f   :  { %v656_v23 = vrot.slane %v640_v13, %v1352_v47  ;;  %v573_v8 = vsel %vm571_vm8, %v572_v15, %v570_v26  ;;  %v663_v39 = vrot.slane %v641_v30, %v1352_v47  ;;  %v713_v7 = vsub.s32 1, %v1656_v37 }
  0xa0   :  { %v638_v52 = vcombine.low %v630_v14, %v637_v56  ;;  %v642_v24 = vcombine.low %v566_v18, %v573_v8  ;;  %v717_v11 = vsub.s32 2, %v1656_v37  ;;  %v721_v32 = vsub.s32 3, %v1656_v37 }
  0xa1   :  { %v671_v31 = vcombine.low %v649_v0, %v656_v23  ;;  %v725_v15 = vsub.s32 4, %v1656_v37  ;;  %vm787_vm11 = vcmask 1040384   ;;  %v729_v16 = vsub.s32 5, %v1656_v37 }
  0xa2   :  { %v690_v6 = vsub.f32 %v460_v57, %v638_v52  ;;  %v670_v22 = vrot.slane %v642_v24, %v1352_v47  ;;  %v733_v25 = vsub.s32 6, %v1656_v37  ;;  %vm829_vm13 = vcmask 0  }
  0xa3   :  { %v679_v45 = vrot.slane %v671_v31, %v1352_v47 }
  0xa4   :  { %v694_v5 = vmul.f32 %v690_v6, %v690_v6  ;;  %v672_v53 = vcombine.low %v663_v39, %v670_v22 }
  0xa6   :  { %v710_v1 = vrot.slane %v694_v5, %v709_v55  ;;  %v714_v34 = vrot.slane %v694_v5, %v713_v7  ;;  %v718_v38 = vrot.slane %v694_v5, %v717_v11  ;;  %v722_v51 = vrot.slane %v694_v5, %v721_v32 }
  0xa7   :  { %v686_v44 = vrot.slane %v672_v53, %v1352_v47  ;;  %v726_v19 = vrot.slane %v694_v5, %v725_v15  ;;  %v730_v10 = vrot.slane %v694_v5, %v729_v16  ;;  %v737_v47 = vsub.s32 7, %v1656_v37 }
  0xa8   :  { %v788_v17 = vsel %vm787_vm11, %v710_v1, 0.0  ;;  %v789_v9 = vsel %vm787_vm11, %v714_v34, 0.0  ;;  %v791_v46 = vsel %vm787_vm11, %v718_v38, 0.0  ;;  %v793_v12 = vsel %vm787_vm11, %v722_v51, 0.0 }
  0xa9   :  { %v687_v50 = vcombine.low %v679_v45, %v686_v44  ;;  %v790_v61 = vadd.f32 %v789_v9, %v788_v17  ;;  %v734_v48 = vrot.slane %v694_v5, %v733_v25  ;;  %v795_v2 = vsel %vm787_vm11, %v726_v19, 0.0 }
  0xaa   :  { %v738_v33 = vrot.slane %v694_v5, %v737_v47  ;;  %v797_v20 = vsel %vm787_vm11, %v730_v10, 0.0 }
  0xab   :  { %v691_v27 = vsub.f32 %v461_v40, %v687_v50  ;;  %v792_v21 = vadd.f32 %v791_v46, %v790_v61  ;;  %v799_v63 = vsel %vm787_vm11, %v734_v48, 0.0 }
  0xac   :  { %v801_v35 = vsel %vm787_vm11, %v738_v33, 0.0 }
  0xad   :  { %v794_v59 = vadd.f32 %v793_v12, %v792_v21  ;;  %v695_v54 = vmul.f32 %v691_v27, %v691_v27 }
  0xaf   :  { %v796_v60 = vadd.f32 %v795_v2, %v794_v59  ;;  %v742_v28 = vrot.slane %v695_v54, %v709_v55  ;;  %v746_v41 = vrot.slane %v695_v54, %v713_v7  ;;  %v750_v49 = vrot.slane %v695_v54, %v717_v11 }
  0xb0   :  { %v754_v43 = vrot.slane %v695_v54, %v721_v32  ;;  %v758_v29 = vrot.slane %v695_v54, %v725_v15  ;;  %v762_v58 = vrot.slane %v695_v54, %v729_v16  ;;  %v766_v0 = vrot.slane %v695_v54, %v733_v25 }
  0xb1   :  { %v798_v3 = vadd.f32 %v797_v20, %v796_v60  ;;  %v803_v37 = vsel %vm787_vm11, %v742_v28, 0.0  ;;  %v805_v36 = vsel %vm787_vm11, %v746_v41, 0.0  ;;  %v807_v14 = vsel %vm787_vm11, %v750_v49, 0.0 }
  0xb2   :  { %v809_v56 = vsel %vm787_vm11, %v754_v43, 0.0  ;;  %v811_v57 = vsel %vm787_vm11, %v758_v29, 0.0  ;;  %v770_v26 = vrot.slane %v695_v54, %v737_v47  ;;  %v813_v23 = vsel %vm787_vm11, %v762_v58, 0.0 }
  0xb3   :  { %v800_v62 = vadd.f32 %v799_v63, %v798_v3  ;;  %v815_v52 = vsel %vm787_vm11, %v766_v0, 0.0 }
  0xb4   :  { %v817_v39 = vsel %vm787_vm11, %v770_v26, 0.0 }
  0xb5   :  { %v802_v4 = vadd.f32 %v801_v35, %v800_v62 }
  0xb7   :  { %v804_v42 = vadd.f32 %v803_v37, %v802_v4 }
  0xb9   :  { %v806_v13 = vadd.f32 %v805_v36, %v804_v42 }
  0xbb   :  { %v808_v30 = vadd.f32 %v807_v14, %v806_v13 }
  0xbd   :  { %v810_v18 = vadd.f32 %v809_v56, %v808_v30 }
  0xbf   :  { %v812_v8 = vadd.f32 %v811_v57, %v810_v18 }
  0xc1   :  { %v814_v24 = vadd.f32 %v813_v23, %v812_v8 }
  0xc3   :  { %v816_v31 = vadd.f32 %v815_v52, %v814_v24 }
  0xc5   :  { %v818_v55 = vadd.f32 %v817_v39, %v816_v31 }
  0xc7   :  { %819 = vadd.xlane.f32.xlu0 %v818_v55 }
 0x150   :  { %v820_v6 = vpop.xlane.xlu0 %819 }
 0x151   :  { %v821_v7 = vrot.slane %v820_v6, 4 }
 0x153   :  { %v822_v11 = vadd.f32 %v821_v7, %v820_v6 }
 0x155   :  { %v823_v32 = vrot.slane %v822_v11, 2 }
 0x157   :  { %v824_v22 = vadd.f32 %v823_v32, %v822_v11 }
 0x159   :  { %v825_v5 = vrot.slane %v824_v22, 1 }
 0x15b   :  { %v826_v53 = vadd.f32 %v825_v5, %v824_v22 }
 0x15d   :  { %847 = vpush %v826_v53 }
 0x18e   :  { %s848_s28 = spop %847 }
 0x18f   :  { %v828_v45 = vstv %s848_s28 }
 0x190   :  { %830 = vst.msk [vmem:[#allocation9] sm:$0x1] %vm829_vm13, %v828_v45 }
 0x191   :  { %959 = shalt.err (!%p956_p5)
}
 0x192   :  { %840 = dma.vmem_to_hbm [thread:$0]  %s838_s2, 16, %s1593_s3, [#allocation5]  }
 0x193   :  { %972 = dma.done.wait [#allocation5], 16  }
 0x194   :  { %973 = vsyncadd [#allocation5], 4294967280 }
 0x195   :  { %844 = vsyncpa [#allocation4], 1 }
 0x196   :  { %845 = vsyncpa [#allocation7], 1 }
 0x197   :  { %846 = vsyncpa [#allocation5], 1 }

</bundles_post_ra>
